<compile_context>
chip_gen: v5e
topology: v5e:2x2
jax: 0.10.0
libtpu: 0.0.40
codegen_flags: <defaults>
</compile_context>

<pallas_src>
import functools
import math

import jax
import jax.numpy as jnp
from jax.experimental import pallas as pl
from jax.experimental.pallas import tpu as pltpu


def _sdpa_kernel(q_ref, kt_ref, v_ref, m_ref, *out_refs, scale, emit_attn):
    # Block shapes:
    #   q_ref:       (1, H, Tq, D)
    #   kt_ref:      (1, H, D, S)   (K pre-transposed in the wrapper)
    #   v_ref:       (1, H, S, D)
    #   m_ref:       (1, 1, S) int32 key-validity (shared by all heads / rows)
    #   out_refs[0]: (1, H, Tq, D)
    #   out_refs[1]: (1, H, Tq, S)  (only present when emit_attn)
    out_ref = out_refs[0]

    q = q_ref[0]                       # (H, Tq, D)
    kt = kt_ref[0]                     # (H, D, S)
    v = v_ref[0]                       # (H, S, D)
    valid = (m_ref[0] != 0)[None]      # (1, 1, S) bool -> broadcasts over (H, Tq, S)

    # Unscaled scores; contraction dim D is LHS-minor / RHS-sublane -> plain MXU matmul.
    s = jnp.einsum("hqd,hds->hqs", q, kt, preferred_element_type=jnp.float32)

    # masked_fill(mask == 0, -1e9) on the unscaled scores: exp() of masked keys
    # still underflows to exactly 0 and fully-masked rows still give the uniform
    # 1/S row, matching the PyTorch finite -1e9 behaviour.
    s = jnp.where(valid, s, jnp.float32(-1e9))

    # Numerically-stable softmax with 1/sqrt(hidden_units) folded into the exp
    # argument (no standalone `scores * scale` pass over the big tensor).
    row_max = jnp.max(s, axis=-1, keepdims=True)
    p = jnp.exp((s - row_max) * jnp.float32(scale))
    denom = jnp.sum(p, axis=-1, keepdims=True)
    attn = p * pl.reciprocal(denom, approx=True)   # EUP slot, otherwise idle here

    # Single cast of attn, reused for both the PV matmul and the attn_dist store.
    attn_low = attn.astype(v.dtype)

    # output = attn @ V; contraction dim S is LHS-minor / RHS-sublane -> MXU matmul.
    out = jnp.einsum("hqs,hsd->hqd", attn_low, v, preferred_element_type=jnp.float32)
    out_ref[0] = out.astype(out_ref.dtype)

    if emit_attn:
        out_refs[1][0] = attn_low.astype(out_refs[1].dtype)


def _choose_tile(S):
    """Return (S_pad, Tq): pad S to a multiple of 128 when needed, Tq in {S<=256, 128, 256}."""
    if S <= 256:
        return S, S
    if S % 256 == 0:
        return S, 256
    if S % 128 == 0:
        return S, 128
    s_pad = ((S + 127) // 128) * 128
    return s_pad, 128


def _vmem_budget_bytes():
    """~75% of the detected per-core VMEM (48 MiB on v7x, 96 MiB on v5e/v6e)."""
    try:
        cap = int(pltpu.get_tpu_info().vmem_capacity_bytes)
    except Exception:
        cap = 64 * 1024 * 1024  # conservative fallback (v7x per-TensorCore)
    return max((cap * 3) // 4, 32 * 1024 * 1024)


def _footprint_bytes(H, s_pad, D, tq, kv_buffers, itemsize, emit_attn):
    """Per-step VMEM estimate: pipelined block buffers + f32 softmax intermediates."""
    q_in = 2 * H * tq * D * itemsize
    kv_in = kv_buffers * 2 * H * s_pad * D * itemsize      # K_t and V
    m_in = 2 * s_pad * 4
    out_o = 2 * H * tq * D * itemsize
    attn_o = (2 * H * tq * s_pad * itemsize) if emit_attn else 0
    # scores / exp / low-dtype attn copies + f32 out accumulator + Mosaic scratch slack
    interm = 3 * H * tq * s_pad * 4 + H * tq * D * 4 + (1 << 20)
    return q_in + kv_in + m_in + out_o + attn_o + interm


def _plan(H, S, D, itemsize, emit_attn, budget):
    """Pick (S_pad, Tq, kv_buffers) so the per-step footprint fits the VMEM budget."""
    s_pad, tq = _choose_tile(S)
    tq_cands = [tq]
    if tq > 128 and s_pad % 128 == 0:
        tq_cands.append(128)
    for t in tq_cands:
        for kvb in (2, 1):
            if _footprint_bytes(H, s_pad, D, t, kvb, itemsize, emit_attn) <= budget:
                return s_pad, t, kvb
    return s_pad, tq_cands[-1], 1


def scaled_dot_product_attention(Q, K, V, mask, hidden_units, *, return_attn_dist=True):
    """Eval-mode Pallas TPU forward of BERT4Rec ScaledDotProductAttention.

    Q, K, V: [B, H, S, D].
    mask: either a [B, S] key-validity vector (nonzero = attendable key) or the
      BERT4Rec [B, 1, S, S] padding mask (which only encodes key validity — every
      query row is identical), in which case query-row 0 is used.
    hidden_units: the value the PyTorch module divides by (interface preserved).
    Returns (output [B, H, S, D], attn_dist [B, H, S, S] or None).
    """
    B, H, S, D = Q.shape

    if mask.ndim == 4:
        # BERT4Rec padding mask: identical across query rows & heads -> one row suffices.
        key_valid = mask[:, 0, 0, :]
    elif mask.ndim == 2:
        key_valid = mask
    else:
        raise ValueError(f"unsupported mask rank {mask.ndim}")
    key_valid = key_valid != 0

    emit_attn = bool(return_attn_dist)
    itemsize = jnp.dtype(Q.dtype).itemsize
    budget = _vmem_budget_bytes()
    s_pad, tq, kv_buffers = _plan(H, S, D, itemsize, emit_attn, budget)

    if s_pad != S:
        pad = s_pad - S
        zpad4 = ((0, 0), (0, 0), (0, pad), (0, 0))
        Q = jnp.pad(Q, zpad4)
        K = jnp.pad(K, zpad4)
        V = jnp.pad(V, zpad4)
        key_valid = jnp.pad(key_valid, ((0, 0), (0, pad)))  # padded keys are invalid

    # Pre-transpose K once in HBM -> the QK^T contraction is a plain MXU matmul.
    K_t = jnp.swapaxes(K, 2, 3)                              # (B, H, D, S_pad)
    key_mask = key_valid.astype(jnp.int32).reshape(B, 1, s_pad)

    nq = s_pad // tq
    scale = 1.0 / math.sqrt(hidden_units)
    kernel = functools.partial(_sdpa_kernel, scale=scale, emit_attn=emit_attn)

    # K/V change only with b; single-buffer them when VMEM is tight (v7x).
    kv_mode = {} if kv_buffers == 2 else {"pipeline_mode": pl.Buffered(1)}
    q_spec = pl.BlockSpec((1, H, tq, D), lambda b, qi: (b, 0, qi, 0))
    kt_spec = pl.BlockSpec((1, H, D, s_pad), lambda b, qi: (b, 0, 0, 0), **kv_mode)
    v_spec = pl.BlockSpec((1, H, s_pad, D), lambda b, qi: (b, 0, 0, 0), **kv_mode)
    m_spec = pl.BlockSpec((1, 1, s_pad), lambda b, qi: (b, 0, 0))
    out_spec = pl.BlockSpec((1, H, tq, D), lambda b, qi: (b, 0, qi, 0))

    if emit_attn:
        out_shape = (
            jax.ShapeDtypeStruct((B, H, s_pad, D), Q.dtype),
            jax.ShapeDtypeStruct((B, H, s_pad, s_pad), Q.dtype),
        )
        out_specs = (
            out_spec,
            pl.BlockSpec((1, H, tq, s_pad), lambda b, qi: (b, 0, qi, 0)),
        )
    else:
        out_shape = jax.ShapeDtypeStruct((B, H, s_pad, D), Q.dtype)
        out_specs = out_spec

    result = pl.pallas_call(
        kernel,
        out_shape=out_shape,
        grid_spec=pltpu.PrefetchScalarGridSpec(
            num_scalar_prefetch=0,
            grid=(B, nq),  # b outer so K/V are DMA'd once per batch element
            in_specs=[q_spec, kt_spec, v_spec, m_spec],
            out_specs=out_specs,
        ),
        compiler_params=pltpu.CompilerParams(
            dimension_semantics=("parallel", "parallel"),
            vmem_limit_bytes=int(budget),
        ),
    )(Q, K_t, V, key_mask)

    if emit_attn:
        out, attn = result
    else:
        out, attn = result, None

    if s_pad != S:
        out = out[:, :, :S, :]
        if attn is not None:
            attn = attn[:, :, :S, :S]
    return out, attn


def _reference(Q, K, V, mask4d, hidden_units):
    """Pure-JAX reference mirroring the PyTorch forward (eval mode)."""
    scores = jnp.einsum(
        "bhqd,bhkd->bhqk", Q, K, preferred_element_type=jnp.float32
    ) / math.sqrt(hidden_units)
    scores = jnp.where(mask4d == 0, -1e9, scores)
    attn = jax.nn.softmax(scores, axis=-1)
    out = jnp.einsum("bhqk,bhkd->bhqd", attn, V)
    return out, attn


if __name__ == "__main__":
    # --- Test 1: small shapes, full (output, attn_dist) module interface ----
    B, H, S, D = 2, 2, 8, 32
    hidden_units = H * D  # the module scales by the full hidden size

    key = jax.random.PRNGKey(0)
    kq, kk, kv, kq2, kk2, kv2 = jax.random.split(key, 6)
    Q = jax.random.normal(kq, (B, H, S, D), dtype=jnp.float32)
    K = jax.random.normal(kk, (B, H, S, D), dtype=jnp.float32)
    V = jax.random.normal(kv, (B, H, S, D), dtype=jnp.float32)

    # BERT4Rec-style padding mask: [B, 1, S, S] bool, keys valid per batch.
    lengths = jnp.array([6, 8])
    key_valid = jnp.arange(S)[None, :] < lengths[:, None]          # (B, S)
    mask4d = jnp.broadcast_to(key_valid[:, None, None, :], (B, 1, S, S))

    out, attn = scaled_dot_product_attention(Q, K, V, mask4d, hidden_units)
    out, attn = jax.block_until_ready((out, attn))

    ref_out, ref_attn = _reference(Q, K, V, mask4d, hidden_units)
    # Tolerance 2e-3: pl.reciprocal(approx=True) carries ~2^-12 relative error
    # on the softmax denominator.
    assert jnp.allclose(out, ref_out, atol=2e-3, rtol=2e-3), "output mismatch"
    assert jnp.allclose(attn, ref_attn, atol=2e-3, rtol=2e-3), "attn mismatch"

    # Output-only fast path: the dominant [B,H,S,S] HBM stream is not written.
    out2, none_attn = scaled_dot_product_attention(
        Q, K, V, key_valid, hidden_units, return_attn_dist=False
    )
    out2 = jax.block_until_ready(out2)
    assert none_attn is None
    assert jnp.allclose(out2, ref_out, atol=2e-3, rtol=2e-3), "output-only mismatch"

    # --- Test 2: S > 256 exercises the query-tiled grid (Tq=128, nq=3) ------
    B2, H2, S2, D2 = 1, 2, 384, 32
    Q2 = jax.random.normal(kq2, (B2, H2, S2, D2), dtype=jnp.float32)
    K2 = jax.random.normal(kk2, (B2, H2, S2, D2), dtype=jnp.float32)
    V2 = jax.random.normal(kv2, (B2, H2, S2, D2), dtype=jnp.float32)
    key_valid2 = jnp.arange(S2)[None, :] < 300                      # (B2, S2)

    out3, attn3 = scaled_dot_product_attention(Q2, K2, V2, key_valid2, H2 * D2)
    out3, attn3 = jax.block_until_ready((out3, attn3))

    mask4d2 = jnp.broadcast_to(key_valid2[:, None, None, :], (B2, 1, S2, S2))
    ref_out3, ref_attn3 = _reference(Q2, K2, V2, mask4d2, H2 * D2)
    assert jnp.allclose(out3, ref_out3, atol=2e-3, rtol=2e-3), "tiled output mismatch"
    assert jnp.allclose(attn3, ref_attn3, atol=2e-3, rtol=2e-3), "tiled attn mismatch"

    print("KERNEL_OK")
</pallas_src>

<mosaic_0001>
module attributes {stable_mosaic.version = 11 : i64} {
  func.func @_sdpa_kernel(%arg0: i32, %arg1: i32, %arg2: memref<1x2x8x32xf32, #tpu.memory_space<vmem>>, %arg3: memref<1x2x32x8xf32, #tpu.memory_space<vmem>>, %arg4: memref<1x2x8x32xf32, #tpu.memory_space<vmem>>, %arg5: memref<1x1x8xi32, #tpu.memory_space<vmem>>, %arg6: memref<1x2x8x32xf32, #tpu.memory_space<vmem>>, %arg7: memref<1x2x8x8xf32, #tpu.memory_space<vmem>>) attributes {dimension_semantics = [#tpu.dimension_semantics<parallel>, #tpu.dimension_semantics<parallel>], iteration_bounds = array<i64: 2, 1>, scalar_prefetch = 0 : i64, scratch_operands = 0 : i64, tpu.core_type = #tpu.core_type<tc>, window_params = [{transform_indices = @transform_0, window_bounds = array<i64: 1, 2, 8, 32>}, {transform_indices = @transform_1, window_bounds = array<i64: 1, 2, 32, 8>}, {transform_indices = @transform_2, window_bounds = array<i64: 1, 2, 8, 32>}, {transform_indices = @transform_3, window_bounds = array<i64: 1, 1, 8>}, {transform_indices = @transform_4, window_bounds = array<i64: 1, 2, 8, 32>}, {transform_indices = @transform_5, window_bounds = array<i64: 1, 2, 8, 8>}]} {
    %c0 = arith.constant 0 : index
    %c0_0 = arith.constant 0 : index
    %c0_1 = arith.constant 0 : index
    %c0_2 = arith.constant 0 : index
    %0 = vector.load %arg2[%c0, %c0_0, %c0_1, %c0_2] : memref<1x2x8x32xf32, #tpu.memory_space<vmem>>, vector<1x2x8x32xf32>
    %1 = vector.shape_cast %0 : vector<1x2x8x32xf32> to vector<2x8x32xf32>
    %c0_3 = arith.constant 0 : index
    %c0_4 = arith.constant 0 : index
    %c0_5 = arith.constant 0 : index
    %c0_6 = arith.constant 0 : index
    %2 = vector.load %arg3[%c0_3, %c0_4, %c0_5, %c0_6] : memref<1x2x32x8xf32, #tpu.memory_space<vmem>>, vector<1x2x32x8xf32>
    %3 = vector.shape_cast %2 : vector<1x2x32x8xf32> to vector<2x32x8xf32>
    %c0_7 = arith.constant 0 : index
    %c0_8 = arith.constant 0 : index
    %c0_9 = arith.constant 0 : index
    %c0_10 = arith.constant 0 : index
    %4 = vector.load %arg4[%c0_7, %c0_8, %c0_9, %c0_10] : memref<1x2x8x32xf32, #tpu.memory_space<vmem>>, vector<1x2x8x32xf32>
    %5 = vector.shape_cast %4 : vector<1x2x8x32xf32> to vector<2x8x32xf32>
    %c0_11 = arith.constant 0 : index
    %c0_12 = arith.constant 0 : index
    %c0_13 = arith.constant 0 : index
    %6 = vector.load %arg5[%c0_11, %c0_12, %c0_13] : memref<1x1x8xi32, #tpu.memory_space<vmem>>, vector<1x1x8xi32>
    %7 = vector.shape_cast %6 : vector<1x1x8xi32> to vector<1x8xi32>
    %c0_i32 = arith.constant 0 : i32
    %8 = vector.broadcast %c0_i32 : i32 to vector<1x8xi32>
    %9 = arith.cmpi ne, %7, %8 : vector<1x8xi32>
    %10 = vector.shape_cast %9 : vector<1x8xi1> to vector<1x1x8xi1>
    "tpu.trace_start"() <{level = 10 : i32, message = "hqd,hds->hqs"}> : () -> ()
    %cst = arith.constant dense<0.000000e+00> : vector<2x8x8xf32>
    %11 = tpu.matmul %1, %3, %cst {dimension_numbers = #tpu.dot_dimension_numbers<[2], [1], [1], [2], [0, 0, 0, 1, 1, 2], [0], [0]>} : vector<2x8x32xf32>, vector<2x32x8xf32>, vector<2x8x8xf32> -> vector<2x8x8xf32>
    %cst_14 = arith.constant -1.000000e+09 : f32
    "tpu.trace_stop"() : () -> ()
    %12 = vector.shape_cast %10 : vector<1x1x8xi1> to vector<1x1x8xi1>
    %13 = vector.broadcast %12 : vector<1x1x8xi1> to vector<2x8x8xi1>
    %14 = vector.broadcast %cst_14 : f32 to vector<2x8x8xf32>
    %15 = arith.select %13, %11, %14 : vector<2x8x8xi1>, vector<2x8x8xf32>
    %cst_15 = arith.constant dense<0xFF800000> : vector<2x8xf32>
    %16 = vector.multi_reduction <maximumf>, %15, %cst_15 [2] : vector<2x8x8xf32> to vector<2x8xf32>
    %17 = vector.shape_cast %16 : vector<2x8xf32> to vector<2x8x1xf32>
    %18 = vector.broadcast %17 : vector<2x8x1xf32> to vector<2x8x8xf32>
    %19 = arith.subf %15, %18 : vector<2x8x8xf32>
    %cst_16 = arith.constant 1.250000e-01 : f32
    %20 = vector.broadcast %cst_16 : f32 to vector<2x8x8xf32>
    %21 = arith.mulf %19, %20 : vector<2x8x8xf32>
    %22 = math.exp %21 : vector<2x8x8xf32>
    %cst_17 = arith.constant dense<0.000000e+00> : vector<2x8xf32>
    %23 = vector.multi_reduction <add>, %22, %cst_17 [2] : vector<2x8x8xf32> to vector<2x8xf32>
    %24 = vector.shape_cast %23 : vector<2x8xf32> to vector<2x8x1xf32>
    %25 = tpu.reciprocal %24 {approx = true} : vector<2x8x1xf32> -> vector<2x8x1xf32>
    %26 = vector.broadcast %25 : vector<2x8x1xf32> to vector<2x8x8xf32>
    %27 = arith.mulf %22, %26 : vector<2x8x8xf32>
    "tpu.trace_start"() <{level = 10 : i32, message = "hqs,hsd->hqd"}> : () -> ()
    %cst_18 = arith.constant dense<0.000000e+00> : vector<2x8x32xf32>
    %28 = tpu.matmul %27, %5, %cst_18 {dimension_numbers = #tpu.dot_dimension_numbers<[2], [1], [1], [2], [0, 0, 0, 1, 1, 2], [0], [0]>} : vector<2x8x8xf32>, vector<2x8x32xf32>, vector<2x8x32xf32> -> vector<2x8x32xf32>
    "tpu.trace_stop"() : () -> ()
    %c0_19 = arith.constant 0 : index
    %c0_20 = arith.constant 0 : index
    %c0_21 = arith.constant 0 : index
    %c0_22 = arith.constant 0 : index
    %29 = vector.load %arg6[%c0_19, %c0_20, %c0_21, %c0_22] : memref<1x2x8x32xf32, #tpu.memory_space<vmem>>, vector<1x2x8x32xf32>
    %30 = vector.shape_cast %29 : vector<1x2x8x32xf32> to vector<2x8x32xf32>
    %31 = vector.shape_cast %28 : vector<2x8x32xf32> to vector<1x2x8x32xf32>
    tpu.vector_store %arg6[%c0_19, %c0_20, %c0_21, %c0_22], %31 {strides = array<i32>} : memref<1x2x8x32xf32, #tpu.memory_space<vmem>>, vector<1x2x8x32xf32>,
    %c0_23 = arith.constant 0 : index
    %c0_24 = arith.constant 0 : index
    %c0_25 = arith.constant 0 : index
    %c0_26 = arith.constant 0 : index
    %32 = vector.load %arg7[%c0_23, %c0_24, %c0_25, %c0_26] : memref<1x2x8x8xf32, #tpu.memory_space<vmem>>, vector<1x2x8x8xf32>
    %33 = vector.shape_cast %32 : vector<1x2x8x8xf32> to vector<2x8x8xf32>
    %34 = vector.shape_cast %27 : vector<2x8x8xf32> to vector<1x2x8x8xf32>
    tpu.vector_store %arg7[%c0_23, %c0_24, %c0_25, %c0_26], %34 {strides = array<i32>} : memref<1x2x8x8xf32, #tpu.memory_space<vmem>>, vector<1x2x8x8xf32>,
    return
  }
  func.func @transform_0(%arg0: i32, %arg1: i32) -> (i32, i32, i32, i32) {
    %c0_i32 = arith.constant 0 : i32
    %c0_i32_0 = arith.constant 0 : i32
    %c0_i32_1 = arith.constant 0 : i32
    return %arg0, %c0_i32, %arg1, %c0_i32_0 : i32, i32, i32, i32
  }
  func.func @transform_1(%arg0: i32, %arg1: i32) -> (i32, i32, i32, i32) {
    %c0_i32 = arith.constant 0 : i32
    %c0_i32_0 = arith.constant 0 : i32
    %c0_i32_1 = arith.constant 0 : i32
    %c0_i32_2 = arith.constant 0 : i32
    return %arg0, %c0_i32, %c0_i32_0, %c0_i32_1 : i32, i32, i32, i32
  }
  func.func @transform_2(%arg0: i32, %arg1: i32) -> (i32, i32, i32, i32) {
    %c0_i32 = arith.constant 0 : i32
    %c0_i32_0 = arith.constant 0 : i32
    %c0_i32_1 = arith.constant 0 : i32
    %c0_i32_2 = arith.constant 0 : i32
    return %arg0, %c0_i32, %c0_i32_0, %c0_i32_1 : i32, i32, i32, i32
  }
  func.func @transform_3(%arg0: i32, %arg1: i32) -> (i32, i32, i32) {
    %c0_i32 = arith.constant 0 : i32
    %c0_i32_0 = arith.constant 0 : i32
    %c0_i32_1 = arith.constant 0 : i32
    return %arg0, %c0_i32, %c0_i32_0 : i32, i32, i32
  }
  func.func @transform_4(%arg0: i32, %arg1: i32) -> (i32, i32, i32, i32) {
    %c0_i32 = arith.constant 0 : i32
    %c0_i32_0 = arith.constant 0 : i32
    %c0_i32_1 = arith.constant 0 : i32
    return %arg0, %c0_i32, %arg1, %c0_i32_0 : i32, i32, i32, i32
  }
  func.func @transform_5(%arg0: i32, %arg1: i32) -> (i32, i32, i32, i32) {
    %c0_i32 = arith.constant 0 : i32
    %c0_i32_0 = arith.constant 0 : i32
    %c0_i32_1 = arith.constant 0 : i32
    return %arg0, %c0_i32, %arg1, %c0_i32_0 : i32, i32, i32, i32
  }
}

</mosaic_0001>

<bundles_post_ra>
// kernel: tpu_custom_call.1
= control target key start
LH: loop header
LB: loop body
LE: loop exit
PB: predicated region body
PF: predicated region fallthrough
CT: control target
= control target key end

     0   :  { %11 = vsyncpa [#allocation3], 0  ;;  %s1043_s0 = inlined_call_operand.vmem [shape: f32[2,2,8,32], index: 0, kind: input, shape index: {}]   ;;  %s1044_s1 = inlined_call_operand.vmem [shape: f32[2,2,32,8], index: 1, kind: input, shape index: {}]   ;;  %s1045_s2 = inlined_call_operand.vmem [shape: f32[2,2,8,32], index: 2, kind: input, shape index: {}]   ;;  %s1046_s3 = inlined_call_operand.vmem [shape: s32[2,1,8], index: 3, kind: input, shape index: {}]   ;;  %s1047_s4 = inlined_call_operand.hbm [shape: f32[2,2,8,32], index: 4, kind: output, shape index: {0}]   ;;  %s1048_s5 = inlined_call_operand.hbm [shape: f32[2,2,8,8], index: 5, kind: output, shape index: {1}]  }
   0x1   :  { %13 = vsyncpa [#allocation3 + $0x1], 0 }
   0x2   :  { %14 = vsyncpa [#allocation5], 0 }
   0x3   :  { %16 = vsyncpa [#allocation5 + $0x1], 0  ;;  %s888_s18 = smov 0   ;;  %s890_s19 = smov 0  }
   0x4   :  { %s892_s20 = smov 0   ;;  %s894_s21 = smov 0  }
   0x5   :  { %s896_s22 = smov 0   ;;  %s898_s23 = smov 0  }
   0x6 LB: > { %s642_s24 = sadd.s32 4294967295, %s853_s23   ;;  %s643_s25 = sadd.s32 4294967294, %s853_s23   ;;  %s853_s23 = sphi %s898_s23, %s22_s23   ;;  %s849_s22 = sphi %s896_s22, %s1055_s22   ;;  %s845_s21 = sphi %s894_s21, %s1054_s21   ;;  %s841_s20 = sphi %s892_s20, %s1053_s20   ;;  %s837_s19 = sphi %s890_s19, %s1052_s19   ;;  %s833_s18 = sphi %s888_s18, %s1051_s18  }
   0x7   : > { %s34_s26 = sadd.s32 1, %s849_s22  ;;  %s149_s27 = sadd.s32 1, %s841_s20 }
   0x8   : > { %p36_p0 = scmp.ge.s32.totalorder %s34_s26, 2  ;;  %p159_p1 = scmp.ne.s32.totalorder %s841_s20, %s837_s19 }
   0x9   : > { %p160_p2 = scmp.eq.s32.totalorder %s642_s24, 1  ;;  %p165_p3 = scmp.ne.s32.totalorder %s837_s19, %s833_s18 }
   0xa   : > { %s1057_s26 = smov (%p36_p0, %s34_s26), 0  ;;  %p166_p5 = scmp.eq.s32.totalorder %s643_s25, 1 }
   0xb   : > { %p928_p4 = por %p160_p2, %p159_p1  ;;  %s144_s29 = ssub.s32 %s849_s22, %s1057_s26 }
   0xc   : > { %p646_p6 = scmp.ge.s32.totalorder %s853_s23, 1  ;;  %p147_p7 = scmp.eq.s32.totalorder %s144_s29, 0 }
   0xd   : > { %p935_p8 = por %p166_p5, %p165_p3  ;;  %p245_p9 = scmp.lt.s32.totalorder %s853_s23, 3 }
   0xe   : > { %s941_s6 = scalar_select %p147_p7, %s841_s20, %s149_s27  }
   0xf   : > { %p246_p10 = pnand %p646_p6, %p245_p9 }
  0x10   : > { %p294_p11 = scmp.lt.s32.totalorder (!%p246_p10), %s845_s21, 1 }
  0x11   : > { %249 = sbr.rel (%p246_p10) target bundleno = 560 (0x230), region = 36 }
  0x16   : > { %s945_s7 = scalar_select %p294_p11, %s845_s21, 1  ;;  %vm329_vm0 = vcmask 261120   ;;  %v855_v11 = vmov 0   ;;  %vm381_vm3 = vcmask 64512  }
  0x18   : > { %s668_s8 = sshll.u32 %s945_s7, 6  ;;  %s667_s12 = sshll.u32 %s945_s7, 4 }
  0x19   : > { %s306_s11 = scalar_lea.vmem %s1044_s1, %s668_s8  ;;  %s301_s15 = scalar_lea.vmem %s1043_s0, %s667_s12 }
  0x1a   : > { %v320_v0 = vld [vmem:[%s306_s11 + $0x18] sm:$0xff]  ;;  %v319_v1 = vld [vmem:[%s306_s11 + $0x10] sm:$0xff]  ;;  %v318_v3 = vld [vmem:[%s306_s11 + $0x8] sm:$0xff]  ;;  %s314_s24 = scalar_lea.vmem %s1046_s3, %s945_s7  ;;  %s311_s29 = scalar_lea.vmem %s1045_s2, %s667_s12 }
  0x1b   : > { %345 = vmatpush.msra.mxu0 %v320_v0  ;;  %v324_v2 = vld [vmem:[%s306_s11 + $0x38] sm:$0xff]  ;;  %v323_v4 = vld [vmem:[%s306_s11 + $0x30] sm:$0xff]  ;;  %v322_v5 = vld [vmem:[%s306_s11 + $0x28] sm:$0xff]  ;;  %s973_s8 = sand.u32 1, %s837_s19  }
  0x1c   : > { %368 = vmatpush.msra.mxu1 %v324_v2  ;;  %v317_v6 = vld [vmem:[%s306_s11] sm:$0xff]  ;;  %v316_v9 = vld [vmem:[%s301_s15 + $0x8] sm:$0xff]  ;;  %s647_s9 = sshll.u32 %s973_s8, 4  ;;  %s462_s16 = scalar_lea.sflag [#allocation5], %s973_s8 }
  0x1d   : > { %346 = vmatpush.msra.mxu0 %v319_v1  ;;  %v315_v7 = vld [vmem:[%s301_s15] sm:$0xff]  ;;  %v326_v33 = vld [vmem:[%s311_s29 + $0x8] sm:$0xff]  ;;  %s293_s7 = scalar_lea.vmem [#allocation4], %s647_s9 }
  0x1e   : > { %369 = vmatpush.msra.mxu1 %v323_v4  ;;  %v321_v8 = vld [vmem:[%s306_s11 + $0x20] sm:$0xff]  ;;  %447 = vmatpush.msra.mxu3 %v326_v33  ;;  %s493_s10 = sshll.u32 %s293_s7, 4  ;;  %s670_s11 = sshll.u32 %s845_s21, 4  ;;  %s494_s10 = int_to_ptr.vmem [resolvable:$true] %s493_s10 }
  0x1f   : > { %347 = vmatpush.msra.mxu0 %v318_v3  ;;  %v327_v10 = vld [vmem:[%s314_s24] sm:$0x1]  ;;  %s492_s14 = scalar_lea.hbm %s1048_s5, %s670_s11 }
  0x20   : > { %370 = vmatpush.msra.mxu1 %v322_v5  ;;  %vm328_vm1 = vcmp.ne.s32.totalorder %v327_v10, 0  ;;  %v325_v32 = vld [vmem:[%s311_s29] sm:$0xff]  ;;  %s495_s15 = sshll.u32 %s492_s14, 4  ;;  %s763_s29 = scalar_lea.hbm %s1048_s5, 32  ;;  %s496_s15 = int_to_ptr.hbm [resolvable:$true] %s495_s15 }
  0x21   : > { %348 = vmatpush.msra.mxu0 %v317_v6  ;;  %v376_v12 = vsel %vm328_vm1, 1, %v855_v11  ;;  %424 = vmatpush.msra.mxu2 %v325_v32  ;;  %s757_s17 = sshra.s32 %s496_s15, 4  ;;  %s758_s17 = int_to_ptr.hbm [resolvable:$true] %s757_s17 }
  0x22   : > { %655 = vmatmul.msk.f32.vlgmr.msra.gmra.mxu0 %vm329_vm0, %v315_v7  ;;  %371 = vmatpush.msra.mxu1 %v321_v8  ;;  %v377_v13 = vperm.slane %v376_v12, 0  ;;  %s759_s24 = scalar_lea.hbm %s758_s17, 16  ;;  %p764_p1 = scmp.lt.s32.totalorder %s758_s17, %s1048_s5 }
  0x23   : > { %656 = vmatmul.msk.f32.vlgmr.msra.gmra.mxu1 %vm329_vm0, %v316_v9  ;;  %p760_p12 = scmp.ne.s32.totalorder %s758_s17, %s759_s24  ;;  %p765_p2 = scmp.lt.s32.totalorder %s763_s29, %s759_s24 }
  0x24   : > { %vm378_vm2 = vcmp.eq.s32.totalorder %v377_v13, 1 }
  0x25   : > { %p761_p13 = pnand %p760_p12, %p928_p4  ;;  %p766_p3 = por %p765_p2, %p764_p1 }
  0x27   : > { %p762_p0 = pneg %p761_p13 }
  0x29   : > { %p767_p5 = pnand %p766_p3, %p762_p0 }
  0x9f   : > { %v350_v14 = vpop.f32.mrf.mxu0 }
  0xa0   : > { %v379_v15 = vsel %vm378_vm2, %v350_v14, -1e+09  ;;  %v373_v17 = vpop.f32.mrf.mxu1 }
  0xa1   : > { %v382_v16 = vsel %vm381_vm3, %v379_v15, -inf  ;;  %v380_v18 = vsel %vm378_vm2, %v373_v17, -1e+09 }
  0xa2   : > { %383 = vmax.xlane.f32.xlu0 %v382_v16  ;;  %v385_v19 = vsel %vm381_vm3, %v380_v18, -inf }
  0xaa   : > { %386 = vmax.xlane.f32.xlu0 %v385_v19 }
 0x115   : > { %v384_v20 = vpop.xlane.xlu0 %383 }
 0x116   : > { %v388_v21 = vsub.f32 %v379_v15, %v384_v20 }
 0x118   : > { %v390_v22 = vmul.f32 0.125, %v388_v21 }
 0x11a   : > { %v392_v23 = vmul.f32 1.442695, %v390_v22 }
 0x11c   : > { %735 = vpow2.f32 %v392_v23 }
 0x11d   : > { %v387_v24 = vpop.xlane.xlu0 %386 }
 0x11e   : > { %v389_v25 = vsub.f32 %v380_v18, %v387_v24 }
 0x120   : > { %v391_v26 = vmul.f32 0.125, %v389_v25 }
 0x122   : > { %v736_v27 = vpop.eup %735  ;;  %v394_v28 = vmul.f32 1.442695, %v391_v26 }
 0x123   : > { %v396_v29 = vsel %vm381_vm3, %v736_v27, 0.0 }
 0x124   : > { %737 = vpow2.f32 %v394_v28  ;;  %397 = vadd.xlane.f32.xlu1 %v396_v29 }
 0x12a   : > { %v738_v30 = vpop.eup %737 }
 0x12b   : > { %v399_v31 = vsel %vm381_vm3, %v738_v30, 0.0 }
 0x12c   : > { %400 = vadd.xlane.f32.xlu1 %v399_v31 }
 0x197   : > { %v398_v34 = vpop.xlane.xlu1 %397 }
 0x198   : > { %739 = vrcp.f32 %v398_v34 }
 0x19e   : > { %v740_v35 = vpop.eup %739 }
 0x19f   : > { %v401_v36 = vpop.xlane.xlu1 %400  ;;  %v404_v37 = vmul.f32 %v740_v35, %v736_v27 }
 0x1a0   : > { %741 = vrcp.f32 %v401_v36 }
 0x1a1   : > { %657 = vmatmul.msk.f32.vlgmr.msra.gmra.mxu2 %vm381_vm3, %v404_v37  ;;  %454 = vst.msk [vmem:[%s293_s7] sm:$0xff] %vm381_vm3, %v404_v37 }
 0x1a6   : > { %v742_v38 = vpop.eup %741 }
 0x1a7   : > { %v405_v39 = vmul.f32 %v742_v38, %v738_v30 }
 0x1a9   : > { %658 = vmatmul.msk.f32.vlgmr.msra.gmra.mxu3 %vm381_vm3, %v405_v39  ;;  %455 = vst.msk [vmem:[%s293_s7 + $0x8] sm:$0xff] %vm381_vm3, %v405_v39 }
 0x1aa   : > { %770 = shalt.err (!%p767_p5)
}
 0x1ab   : > { %s856_s12 = smov 128   ;;  %s857_s13 = smov 8  }
 0x1ac   : > { %673 = dma.vmem_to_hbm [thread:$0]  (%p928_p4), %s494_s10, 256, %s496_s15, %s462_s16, %s856_s12, %s856_s12, %s857_s13  }
 0x1ad   : > { %s286_s14 = scalar_lea.vmem [#allocation2], %s647_s9  ;;  %s474_s25 = scalar_lea.hbm %s1047_s4, %s670_s11 }
 0x1ae   : > { %s475_s27 = sshll.u32 %s286_s14, 4  ;;  %s477_s29 = sshll.u32 %s474_s25, 4  ;;  %s476_s27 = int_to_ptr.vmem [resolvable:$true] %s475_s27  ;;  %s478_s29 = int_to_ptr.hbm [resolvable:$true] %s477_s29 }
 0x1af   : > { %s457_s21 = scalar_lea.sflag [#allocation3], %s973_s8  ;;  %s785_s7 = sshra.s32 %s478_s29, 4  ;;  %s786_s7 = int_to_ptr.hbm [resolvable:$true] %s785_s7 }
 0x1b0   : > { %s787_s10 = scalar_lea.hbm %s786_s7, 16  ;;  %s791_s16 = scalar_lea.hbm %s1047_s4, 32 }
 0x1b1   : > { %p788_p6 = scmp.ne.s32.totalorder %s786_s7, %s787_s10  ;;  %p792_p10 = scmp.lt.s32.totalorder %s786_s7, %s1047_s4 }
 0x1b2   : > { %p793_p11 = scmp.lt.s32.totalorder %s791_s16, %s787_s10 }
 0x1b3   : > { %p789_p7 = pnand %p788_p6, %p928_p4 }
 0x1b4   : > { %p794_p12 = por %p793_p11, %p792_p10 }
 0x1b5   : > { %p790_p9 = pneg %p789_p7 }
 0x1b7   : > { %p795_p13 = pnand %p794_p12, %p790_p9 }
 0x224   : > { %v426_v40 = vpop.f32.mrf.mxu2 }
 0x225   : > { %452 = vst.msk [vmem:[%s286_s14] sm:$0xff] %vm329_vm0, %v426_v40 }
 0x22c   : > { %v449_v41 = vpop.f32.mrf.mxu3 }
 0x22d   : > { %453 = vst.msk [vmem:[%s286_s14 + $0x8] sm:$0xff] %vm329_vm0, %v449_v41 }
 0x22e   : > { %798 = shalt.err (!%p795_p13)
}
 0x22f   : > { %672 = dma.vmem_to_hbm [thread:$0]  (%p928_p4), %s476_s27, 256, %s478_s29, %s457_s21, %s856_s12, %s856_s12, %s857_s13  }
 0x230 PF: > { %p683_p0 = scmp.ge.s32.totalorder %s853_s23, 2  ;;  %s510_s8 = sand.u32 1, %s833_s18  }
 0x231   : > { %s511_s14 = scalar_lea.sflag [#allocation3], %s510_s8 }
 0x232   : > { %p677_p1 = pnand %p683_p0, %p935_p8 }
 0x234   : > { %p678_p2 = pneg %p677_p1 }
 0x236   : > { %824 = dma.done.wait (%p678_p2), %s511_s14, 256  }
 0x237   : > { %826 = vsyncadd (%p678_p2), %s511_s14, 4294967040  ;;  %s521_s24 = scalar_lea.sflag [#allocation5], %s510_s8 }
 0x238   : > { %828 = dma.done.wait (%p678_p2), %s521_s24, 256  }
 0x239   : > { %830 = vsyncadd (%p678_p2), %s521_s24, 4294967040  ;;  %s22_s23 = sadd.s32 1, %s853_s23   ;;  %s1051_s18 = smov %s837_s19 }
 0x23a   : > { %p19_p3 = scmp.ge.s32.totalorder %s22_s23, 4   ;;  %s1052_s19 = smov %s841_s20 }
 0x23b   : > { %s1053_s20 = smov %s941_s6  ;;  %s1054_s21 = smov %s849_s22 }
 0x23c   : > { %s1055_s22 = smov %s1057_s26  ;;  %21 = sbr.rel (!%p19_p3) target bundleno = 6 (0x6), region = 97 }
 0x241   :  { %527 = vsyncpa [#allocation3], 1 }
 0x242   :  { %529 = vsyncpa [#allocation3 + $0x1], 1 }
 0x243   :  { %530 = vsyncpa [#allocation5], 1 }
 0x244   :  { %532 = vsyncpa [#allocation5 + $0x1], 1 }

</bundles_post_ra>
